<compile_context>
chip_gen: v7x
topology: tpu7x:2x2x1
jax: 0.10.0
libtpu: 0.0.40
codegen_flags: <defaults>
</compile_context>

<pallas_src>
import jax
import jax.numpy as jnp
from jax.experimental import pallas as pl
from jax.experimental.pallas import tpu as pltpu

LN_EPS = 1e-5  # PyTorch nn.LayerNorm default eps


def _round_up(x, m):
    return ((x + m - 1) // m) * m


def _vmem_capacity_and_budget():
    cap = 64 * 1024 * 1024
    try:
        info = pltpu.get_tpu_info()
        cap = int(getattr(info, "vmem_capacity_bytes", cap)) or cap
    except Exception:
        pass
    # v7x-class (64 MiB physical): leave double-buffering headroom.
    # v5e/v6e (128 MiB): use ~100 MiB so bigger tiles cut grid-step overhead.
    frac = 0.75 if cap <= 64 * 1024 * 1024 else 0.80
    return cap, int(cap * frac)


def _layernorm_sigmoid_epilogue(y, p_ref, o_ref):
    """y: (tile_m, N) f32 pre-bias matmul result. Writes sigmoid(LN(y+b)) to o_ref."""
    p = p_ref[...].astype(jnp.float32)          # (3, N): bias / gamma / beta
    bias, gamma, beta = p[0:1], p[1:2], p[2:3]
    y = y + bias
    mean = jnp.mean(y, axis=-1, keepdims=True)
    centered = y - mean
    var = jnp.mean(centered * centered, axis=-1, keepdims=True)
    z = centered * jax.lax.rsqrt(var + LN_EPS) * gamma + beta
    o_ref[...] = jax.nn.sigmoid(z).astype(o_ref.dtype)   # logistic on EUP


def _kernel_single_k(x_ref, w_ref, p_ref, o_ref):
    # Full contraction dim in one block: no accumulator, no pl.when.
    y = jnp.dot(x_ref[...], w_ref[...], preferred_element_type=jnp.float32)
    _layernorm_sigmoid_epilogue(y, p_ref, o_ref)


def _kernel_ktiled_f32out(x_ref, w_ref, p_ref, o_ref):
    # f32 output block is resident across k -> accumulate directly into it.
    k = pl.program_id(1)

    @pl.when(k == 0)
    def _():
        o_ref[...] = jnp.zeros_like(o_ref)

    o_ref[...] += jnp.dot(x_ref[...], w_ref[...],
                          preferred_element_type=jnp.float32)

    @pl.when(k == pl.num_programs(1) - 1)
    def _():
        _layernorm_sigmoid_epilogue(o_ref[...], p_ref, o_ref)


def _kernel_ktiled_acc(x_ref, w_ref, p_ref, o_ref, acc_ref):
    # Narrow output dtype: keep an f32 VMEM accumulator.
    k = pl.program_id(1)

    @pl.when(k == 0)
    def _():
        acc_ref[...] = jnp.zeros_like(acc_ref)

    acc_ref[...] += jnp.dot(x_ref[...], w_ref[...],
                            preferred_element_type=jnp.float32)

    @pl.when(k == pl.num_programs(1) - 1)
    def _():
        _layernorm_sigmoid_epilogue(acc_ref[...], p_ref, o_ref)


def fclayer_forward(x, w, b, gamma, beta, *, mxu_dtype=jnp.bfloat16,
                    out_dtype=None, tile_m=None, tile_k=None):
    batch, in_features = x.shape
    kf, out_features = w.shape
    assert kf == in_features
    out_dtype = jnp.dtype(out_dtype or x.dtype)
    K, N = in_features, out_features

    # Pack bias / gamma / beta into one (3, N) f32 slab (one small DMA).
    params = jnp.stack([jnp.asarray(b).reshape(N),
                        jnp.asarray(gamma).reshape(N),
                        jnp.asarray(beta).reshape(N)]).astype(jnp.float32)

    # Feed the MXU narrow operands when the inputs arrive as f32.
    if mxu_dtype is not None:
        if x.dtype == jnp.float32:
            x = x.astype(mxu_dtype)
        if w.dtype == jnp.float32:
            w = w.astype(mxu_dtype)

    isz, wsz, osz = x.dtype.itemsize, w.dtype.itemsize, out_dtype.itemsize
    pack = 8 * max(1, 4 // max(isz, 1))   # sublane pack: 8 f32 / 16 bf16 / 32 int8
    cap, budget = _vmem_capacity_and_budget()

    def vmem_needed(tm, tk, use_acc):
        return (2 * tm * tk * isz          # x tiles (double-buffered)
                + 2 * tk * N * wsz         # W tiles (double-buffered)
                + 2 * tm * N * osz         # out tiles (double-buffered)
                + 2 * 8 * N * 4            # packed params (sublane-padded)
                + tm * N * 4               # f32 epilogue temporaries
                + (tm * N * 4 if use_acc else 0))

    max_tm = _round_up(batch, pack)
    tm_candidates = sorted({t for t in (1024, 512, 256, 128, 64, 32, 16, 8)
                            if t % pack == 0 and t <= max_tm} | {max_tm},
                           reverse=True)

    auto_tiles = tile_m is None or tile_k is None
    if not auto_tiles:
        tile_m, tile_k = int(tile_m), int(tile_k)
    else:
        chosen = None
        # Preferred structure: full K per block -> no K axis, no accumulator.
        for tm in tm_candidates:
            if vmem_needed(tm, K, False) <= budget:
                chosen = (tm, K)
                break
        if chosen is None:
            # K-tiled fallback: biggest tm first (minimizes W re-streaming),
            # then the biggest 256-aligned tk that fits.
            use_acc = out_dtype != jnp.float32
            tk_candidates = [t for t in (2048, 1024, 512, 256) if t < K]
            for tm in tm_candidates:
                for tk in tk_candidates:
                    if vmem_needed(tm, tk, use_acc) <= budget:
                        chosen = (tm, tk)
                        break
                if chosen is not None:
                    break
        if chosen is None:   # last resort: smallest tiles
            chosen = (tm_candidates[-1], min(K, 256))
        tile_m, tile_k = chosen

    k_tiled = tile_k < K

    # Megacore: if W is VMEM-resident and the whole batch fits one tile, split
    # it in two so a second TensorCore (v7x) gets work; no extra W HBM traffic.
    if auto_tiles and not k_tiled:
        if _round_up(batch, tile_m) // tile_m == 1 and tile_m >= 256 \
                and (tile_m // 2) % pack == 0:
            tile_m //= 2

    padded_m = _round_up(batch, tile_m)
    padded_k = _round_up(K, tile_k) if k_tiled else K
    if padded_m != batch or padded_k != K:
        x = jnp.pad(x, ((0, padded_m - batch), (0, padded_k - K)))
    if padded_k != K:
        w = jnp.pad(w, ((0, padded_k - K), (0, 0)))

    m_tiles = padded_m // tile_m

    if not k_tiled:
        grid = (m_tiles,)
        in_specs = [
            pl.BlockSpec((tile_m, K), lambda i: (i, 0)),     # x
            pl.BlockSpec((K, N), lambda i: (0, 0)),          # W (VMEM resident)
            pl.BlockSpec((3, N), lambda i: (0, 0)),          # packed b/gamma/beta
        ]
        out_spec = pl.BlockSpec((tile_m, N), lambda i: (i, 0))
        scratch = []
        kernel = _kernel_single_k
        dims = ("parallel",)
    else:
        grid = (m_tiles, padded_k // tile_k)
        in_specs = [
            pl.BlockSpec((tile_m, tile_k), lambda i, k: (i, k)),  # x
            pl.BlockSpec((tile_k, N), lambda i, k: (k, 0)),       # W
            pl.BlockSpec((3, N), lambda i, k: (0, 0)),            # params
        ]
        out_spec = pl.BlockSpec((tile_m, N), lambda i, k: (i, 0))
        if out_dtype == jnp.float32:
            scratch = []
            kernel = _kernel_ktiled_f32out
        else:
            scratch = [pltpu.VMEM((tile_m, N), jnp.float32)]
            kernel = _kernel_ktiled_acc
        dims = ("parallel", "arbitrary")

    needed = vmem_needed(tile_m, tile_k, bool(scratch))
    vmem_limit = int(min(cap, max(budget, needed)))

    w_streams = m_tiles if k_tiled else 1   # W re-fetched per M tile when K-tiled
    cost = pl.CostEstimate(
        flops=2 * padded_m * padded_k * N,
        transcendentals=padded_m * N + padded_m,   # sigmoid per elem + rsqrt per row
        bytes_accessed=(padded_m * padded_k * isz
                        + w_streams * padded_k * N * wsz
                        + 3 * N * 4
                        + padded_m * N * osz),
    )

    out = pl.pallas_call(
        kernel,
        out_shape=jax.ShapeDtypeStruct((padded_m, N), out_dtype),
        grid_spec=pltpu.PrefetchScalarGridSpec(
            num_scalar_prefetch=0,
            grid=grid,
            in_specs=in_specs,
            out_specs=out_spec,
            scratch_shapes=scratch,
        ),
        compiler_params=pltpu.CompilerParams(
            dimension_semantics=dims,
            vmem_limit_bytes=vmem_limit,
        ),
        cost_estimate=cost,
    )(x, w, params)

    if padded_m != batch:
        out = out[:batch]
    return out


if __name__ == "__main__":
    batch = 8
    in_features = 32
    out_features = 128

    key = jax.random.PRNGKey(0)
    kx, kw, kb = jax.random.split(key, 3)

    # Deterministic synthetic parameters (no checkpoint load).
    x = jax.random.normal(kx, (batch, in_features), dtype=jnp.float32)
    # nn.Linear-style init (uniform in +/- 1/sqrt(fan_in)), stored as (in, out).
    bound = 1.0 / jnp.sqrt(jnp.float32(in_features))
    w = jax.random.uniform(kw, (in_features, out_features), jnp.float32,
                           -bound, bound)
    b = jax.random.uniform(kb, (out_features,), jnp.float32, -bound, bound)
    # nn.LayerNorm default affine params: weight=1, bias=0.
    gamma = jnp.ones((out_features,), jnp.float32)
    beta = jnp.zeros((out_features,), jnp.float32)

    out = fclayer_forward(x, w, b, gamma, beta)           # bf16 MXU operands
    jax.block_until_ready(out)

    # Reference in plain f32 JAX.
    y_ref = x @ w + b
    mu = jnp.mean(y_ref, axis=-1, keepdims=True)
    var = jnp.mean((y_ref - mu) ** 2, axis=-1, keepdims=True)
    ref = jax.nn.sigmoid((y_ref - mu) / jnp.sqrt(var + LN_EPS) * gamma + beta)

    # bf16 operand feed -> looser tolerance for the default fast path.
    assert jnp.allclose(out, ref, atol=2e-2, rtol=2e-2), \
        float(jnp.max(jnp.abs(out - ref)))

    # Exact f32 MXU path must match tightly.
    out_f32 = fclayer_forward(x, w, b, gamma, beta, mxu_dtype=None)
    jax.block_until_ready(out_f32)
    assert jnp.allclose(out_f32, ref, atol=1e-5, rtol=1e-5), \
        float(jnp.max(jnp.abs(out_f32 - ref)))

    print("KERNEL_OK")
</pallas_src>

<mosaic_0001>
module attributes {stable_mosaic.version = 11 : i64} {
  func.func @_kernel_single_k(%arg0: i32, %arg1: memref<16x32xbf16, #tpu.memory_space<vmem>>, %arg2: memref<32x128xbf16, #tpu.memory_space<vmem>>, %arg3: memref<3x128xf32, #tpu.memory_space<vmem>>, %arg4: memref<16x128xf32, #tpu.memory_space<vmem>>) attributes {dimension_semantics = [#tpu.dimension_semantics<parallel>], iteration_bounds = array<i64: 1>, scalar_prefetch = 0 : i64, scratch_operands = 0 : i64, tpu.core_type = #tpu.core_type<tc>, window_params = [{transform_indices = @transform_0, window_bounds = array<i64: 16, 32>}, {pipeline_mode = #tpu.pipeline_mode<synchronous>, transform_indices = @transform_1, window_bounds = array<i64: 32, 128>}, {pipeline_mode = #tpu.pipeline_mode<synchronous>, transform_indices = @transform_2, window_bounds = array<i64: 3, 128>}, {transform_indices = @transform_3, window_bounds = array<i64: 16, 128>}]} {
    %c0 = arith.constant 0 : index
    %c0_0 = arith.constant 0 : index
    %0 = vector.load %arg1[%c0, %c0_0] : memref<16x32xbf16, #tpu.memory_space<vmem>>, vector<16x32xbf16>
    %c0_1 = arith.constant 0 : index
    %c0_2 = arith.constant 0 : index
    %1 = vector.load %arg2[%c0_1, %c0_2] : memref<32x128xbf16, #tpu.memory_space<vmem>>, vector<32x128xbf16>
    %cst = arith.constant dense<0.000000e+00> : vector<16x128xf32>
    %2 = tpu.matmul %0, %1, %cst {dimension_numbers = #tpu.dot_dimension_numbers<[1], [0], [0], [1], [0, 0, 1, 1], [], []>} : vector<16x32xbf16>, vector<32x128xbf16>, vector<16x128xf32> -> vector<16x128xf32>
    %c0_3 = arith.constant 0 : index
    %c0_4 = arith.constant 0 : index
    %3 = vector.load %arg3[%c0_3, %c0_4] : memref<3x128xf32, #tpu.memory_space<vmem>>, vector<3x128xf32>
    %4 = vector.extract_strided_slice %3 {offsets = [0, 0], sizes = [1, 128], strides = [1, 1]} : vector<3x128xf32> to vector<1x128xf32>
    %5 = vector.extract_strided_slice %3 {offsets = [1, 0], sizes = [1, 128], strides = [1, 1]} : vector<3x128xf32> to vector<1x128xf32>
    %6 = vector.extract_strided_slice %3 {offsets = [2, 0], sizes = [1, 128], strides = [1, 1]} : vector<3x128xf32> to vector<1x128xf32>
    %7 = vector.broadcast %4 : vector<1x128xf32> to vector<16x128xf32>
    %8 = arith.addf %2, %7 : vector<16x128xf32>
    %cst_5 = arith.constant dense<0.000000e+00> : vector<16xf32>
    %9 = vector.multi_reduction <add>, %8, %cst_5 [1] : vector<16x128xf32> to vector<16xf32>
    %10 = vector.shape_cast %9 : vector<16xf32> to vector<16x1xf32>
    %cst_6 = arith.constant 1.280000e+02 : f32
    %11 = vector.broadcast %cst_6 : f32 to vector<16x1xf32>
    %12 = arith.divf %10, %11 : vector<16x1xf32>
    %13 = vector.broadcast %12 : vector<16x1xf32> to vector<16x128xf32>
    %14 = arith.subf %8, %13 : vector<16x128xf32>
    %15 = arith.mulf %14, %14 : vector<16x128xf32>
    %cst_7 = arith.constant dense<0.000000e+00> : vector<16xf32>
    %16 = vector.multi_reduction <add>, %15, %cst_7 [1] : vector<16x128xf32> to vector<16xf32>
    %17 = vector.shape_cast %16 : vector<16xf32> to vector<16x1xf32>
    %cst_8 = arith.constant 1.280000e+02 : f32
    %18 = vector.broadcast %cst_8 : f32 to vector<16x1xf32>
    %19 = arith.divf %17, %18 : vector<16x1xf32>
    %cst_9 = arith.constant 9.99999974E-6 : f32
    %20 = vector.broadcast %cst_9 : f32 to vector<16x1xf32>
    %21 = arith.addf %19, %20 : vector<16x1xf32>
    %22 = math.rsqrt %21 : vector<16x1xf32>
    %23 = vector.broadcast %22 : vector<16x1xf32> to vector<16x128xf32>
    %24 = arith.mulf %14, %23 : vector<16x128xf32>
    %25 = vector.broadcast %5 : vector<1x128xf32> to vector<16x128xf32>
    %26 = arith.mulf %24, %25 : vector<16x128xf32>
    %27 = vector.broadcast %6 : vector<1x128xf32> to vector<16x128xf32>
    %28 = arith.addf %26, %27 : vector<16x128xf32>
    %29 = arith.negf %28 : vector<16x128xf32>
    %30 = math.exp %29 : vector<16x128xf32>
    %cst_10 = arith.constant 1.000000e+00 : f32
    %31 = vector.broadcast %cst_10 : f32 to vector<16x128xf32>
    %32 = arith.addf %31, %30 : vector<16x128xf32>
    %33 = arith.divf %31, %32 : vector<16x128xf32>
    %c0_11 = arith.constant 0 : index
    %c0_12 = arith.constant 0 : index
    %34 = vector.load %arg4[%c0_11, %c0_12] : memref<16x128xf32, #tpu.memory_space<vmem>>, vector<16x128xf32>
    tpu.vector_store %arg4[%c0_11, %c0_12], %33 {strides = array<i32>} : memref<16x128xf32, #tpu.memory_space<vmem>>, vector<16x128xf32>,
    return
  }
  func.func @transform_0(%arg0: i32) -> (i32, i32) {
    %c0_i32 = arith.constant 0 : i32
    %c0_i32_0 = arith.constant 0 : i32
    return %arg0, %c0_i32 : i32, i32
  }
  func.func @transform_1(%arg0: i32) -> (i32, i32) {
    %c0_i32 = arith.constant 0 : i32
    %c0_i32_0 = arith.constant 0 : i32
    %c0_i32_1 = arith.constant 0 : i32
    return %c0_i32, %c0_i32_0 : i32, i32
  }
  func.func @transform_2(%arg0: i32) -> (i32, i32) {
    %c0_i32 = arith.constant 0 : i32
    %c0_i32_0 = arith.constant 0 : i32
    %c0_i32_1 = arith.constant 0 : i32
    return %c0_i32, %c0_i32_0 : i32, i32
  }
  func.func @transform_3(%arg0: i32) -> (i32, i32) {
    %c0_i32 = arith.constant 0 : i32
    %c0_i32_0 = arith.constant 0 : i32
    return %arg0, %c0_i32 : i32, i32
  }
}

</mosaic_0001>

<bundles_post_ra>
// kernel: tpu_custom_call.1
= control target key start
LH: loop header
LB: loop body
LE: loop exit
PB: predicated region body
PF: predicated region fallthrough
CT: control target
= control target key end

     0   :  { %8 = vsyncpa [#allocation3], 0  ;;  %s365_s0 = inlined_call_operand.hbm [shape: bf16[16,32], index: 0, kind: input, shape index: {}]   ;;  %s366_s1 = inlined_call_operand.hbm [shape: bf16[32,128], index: 1, kind: input, shape index: {}]   ;;  %s367_s2 = inlined_call_operand.vmem [shape: f32[3,128], index: 2, kind: input, shape index: {}]   ;;  %s368_s3 = inlined_call_operand.hbm [shape: f32[16,128], index: 3, kind: output, shape index: {}]  }
   0x1   :  { %9 = vsyncpa [#allocation6], 0 }
   0x2   :  { %10 = vsyncpa [#allocation4], 0  ;;  %s297_s12 = smov [#allocation2]   ;;  %s225_s16 = scalar_lea.hbm %s365_s0, 128 }
   0x3   :  { %s16_s13 = sshll.u32 %s297_s12, 4  ;;  %p226_p0 = scmp.ne.s32.totalorder %s365_s0, %s225_s16  ;;  %s17_s13 = int_to_ptr.vmem [resolvable:$true] %s16_s13 }
   0x4   :  { %p229_p1 = scmp.lt.u32.totalorder %s225_s16, %s365_s0 }
   0x6   :  { %p231_p2 = pnand %p229_p1, %p226_p0 }
   0x8   :  { %234 = shalt.err (!%p231_p2)
}
   0x9   :  { %s235_s21 = scalar_lea.vmem %s17_s13, 128  ;;  %p240_p4 = scmp.lt.s32.totalorder %s17_s13, %s17_s13 }
   0xa   :  { %p236_p3 = scmp.ne.s32.totalorder %s17_s13, %s235_s21  ;;  %p241_p5 = scmp.lt.s32.totalorder %s235_s21, %s235_s21 }
   0xc   :  { %p242_p6 = por %p241_p5, %p240_p4 }
   0xe   :  { %p243_p7 = pnand %p242_p6, %p236_p3 }
  0x10   :  { %246 = shalt.err (!%p243_p7)
}
  0x11   :  { %s298_s22 = smov 64   ;;  %s299_s23 = smov 4  }
  0x12   :  { %22 = dma.hbm_to_vmem [thread:$0]  %s365_s0, 128, %s17_s13, [#allocation3], %s298_s22, %s298_s22, %s299_s23  }
  0x13   :  { %s300_s26 = smov [#allocation5]   ;;  %s247_s30 = scalar_lea.hbm %s366_s1, 256 }
  0x14   :  { %s28_s27 = sshll.u32 %s300_s26, 4  ;;  %p248_p8 = scmp.ne.s32.totalorder %s366_s1, %s247_s30  ;;  %s29_s27 = int_to_ptr.vmem [resolvable:$true] %s28_s27 }
  0x15   :  { %p251_p9 = scmp.lt.u32.totalorder %s247_s30, %s366_s1 }
  0x17   :  { %p253_p10 = pnand %p251_p9, %p248_p8 }
  0x19   :  { %256 = shalt.err (!%p253_p10)
}
  0x1a   :  { %s257_s8 = scalar_lea.vmem %s29_s27, 256  ;;  %p262_p12 = scmp.lt.s32.totalorder %s29_s27, %s29_s27 }
  0x1b   :  { %p258_p11 = scmp.ne.s32.totalorder %s29_s27, %s257_s8  ;;  %p263_p13 = scmp.lt.s32.totalorder %s257_s8, %s257_s8 }
  0x1d   :  { %p264_p0 = por %p263_p13, %p262_p12 }
  0x1f   :  { %p265_p1 = pnand %p264_p0, %p258_p11 }
  0x21   :  { %268 = shalt.err (!%p265_p1)
}
  0x22   :  { %34 = dma.hbm_to_vmem [thread:$0]  %s366_s1, 256, %s29_s27, [#allocation6], %s298_s22, %s298_s22, %s299_s23  }
  0x23   :  { %291 = dma.done.wait [#allocation3], 128  }
  0x24   :  { %292 = vsyncadd [#allocation3], 4294967168 }
  0x25   :  { %293 = dma.done.wait [#allocation6], 256  }
  0x26   :  { %294 = vsyncadd [#allocation6], 4294967040  ;;  %v301_v0 = vmov 0.0   ;;  %vm302_vm0 = vmmov 0   ;;  %v210_v1 = vld [vmem:[#allocation5] sm:$0xff]   ;;  %v211_v2 = vld [vmem:[#allocation5 + $0x8] sm:$0xff]   ;;  %v51_v4 = vlaneseq }
  0x27   :  { %193 = vmatprep.subr.bf16.mxu0 %v301_v0  ;;  %197 = vmatprep.mubr.msk.bf16.mxu0 %vm302_vm0, %v301_v0  ;;  %v212_v3 = vld [vmem:[#allocation2] sm:$0xff]   ;;  %vm72_vm1 = vcmask 261120  }
  0x28   :  { %194 = vmatpush3.bf16.msra.mxu0 %v210_v1  ;;  %v52_v5 = vshrl.u32 %v51_v4, 7  ;;  %v50_v7 = vld [vmem:[%s367_s2] sm:$0x7]  ;;  %s303_s2 = smov [#allocation7]  }
  0x29   :  { %195 = vmatprep.subr.bf16.mxu0 %v301_v0  ;;  %s171_s11 = sshll.u32 %s303_s2, 4  ;;  %s172_s11 = int_to_ptr.vmem [resolvable:$true] %s171_s11 }
  0x2a   :  { %v53_v6 = vsub.s32 0, %v52_v5  ;;  %v142_v29 = vsub.s32 1, %v52_v5  ;;  %v148_v30 = vsub.s32 2, %v52_v5  ;;  %s269_s12 = scalar_lea.vmem %s172_s11, 256  ;;  %p274_p3 = scmp.lt.s32.totalorder %s172_s11, %s172_s11 }
  0x2b   :  { %p270_p2 = scmp.ne.s32.totalorder %s172_s11, %s269_s12  ;;  %p275_p4 = scmp.lt.s32.totalorder %s269_s12, %s269_s12 }
  0x2c   :  { %196 = vmatpush3.bf16.msra.mxu0 %v211_v2  ;;  %v54_v8 = vrot.slane %v50_v7, %v53_v6  ;;  %v143_v31 = vrot.slane %v50_v7, %v142_v29  ;;  %v149_v33 = vrot.slane %v50_v7, %v148_v30 }
  0x2d   :  { %p276_p5 = por %p275_p4, %p274_p3 }
  0x2f   :  { %198 = vmatmul.mubr.msk.bf16.vlgmr.msra.gmra.mrb[0].mxu0 %vm72_vm1, %v212_v3  ;;  %p277_p6 = pnand %p276_p5, %p270_p2 }
 0x102   :  { %v110_v9 = vpop.f32.mrb[0].mxu0 }
 0x103   :  { %v111_v10 = vadd.f32 %v110_v9, %v54_v8  ;;  %v199_v11 = vpop.f32.mrb[1].mxu0 }
 0x104   :  { %v113_v12 = vpop.f32.mrb[2].mxu0 }
 0x105   :  { %117 = vadd.xlane.f32.xlu0 %v111_v10  ;;  %v200_v13 = vpop.f32.mrb[3].mxu0  ;;  %v114_v14 = vadd.f32 %v113_v12, %v54_v8 }
 0x109   :  { %119 = vadd.xlane.f32.xlu0 %v114_v14 }
 0x192   :  { %v118_v15 = vpop.xlane.xlu0 %117 }
 0x193   :  { %v122_v16 = vmul.f32 0.0078125, %v118_v15 }
 0x195   :  { %v124_v17 = vsub.f32 %v111_v10, %v122_v16 }
 0x196   :  { %v120_v18 = vpop.xlane.xlu0 %119 }
 0x197   :  { %v123_v19 = vmul.f32 0.0078125, %v120_v18  ;;  %v126_v20 = vmul.f32 %v124_v17, %v124_v17 }
 0x199   :  { %v125_v21 = vsub.f32 %v114_v14, %v123_v19  ;;  %128 = vadd.xlane.f32.xlu1 %v126_v20 }
 0x19b   :  { %v127_v22 = vmul.f32 %v125_v21, %v125_v21 }
 0x19d   :  { %130 = vadd.xlane.f32.xlu1 %v127_v22 }
 0x226   :  { %v129_v23 = vpop.xlane.xlu1 %128 }
 0x227   :  { %v132_v24 = vmul.f32 0.0078125, %v129_v23 }
 0x229   :  { %v134_v25 = vadd.f32 1e-05, %v132_v24 }
 0x22a   :  { %v131_v26 = vpop.xlane.xlu1 %130 }
 0x22b   :  { %213 = vrsqrt.f32 %v134_v25  ;;  %v133_v27 = vmul.f32 0.0078125, %v131_v26 }
 0x22d   :  { %v135_v28 = vadd.f32 1e-05, %v133_v27 }
 0x22f   :  { %215 = vrsqrt.f32 %v135_v28 }
 0x235   :  { %v214_v32 = vpop.eup %213 }
 0x236   :  { %v138_v34 = vmul.f32 %v214_v32, %v124_v17 }
 0x238   :  { %v144_v35 = vmul.f32 %v143_v31, %v138_v34 }
 0x239   :  { %v216_v36 = vpop.eup %215 }
 0x23a   :  { %v150_v37 = vadd.f32 %v149_v33, %v144_v35  ;;  %v139_v38 = vmul.f32 %v216_v36, %v125_v21 }
 0x23c   :  { %v188_v39 = vmul.f32 -1.442695, %v150_v37  ;;  %v145_v40 = vmul.f32 %v143_v31, %v139_v38 }
 0x23e   :  { %217 = vpow2.f32 %v188_v39  ;;  %v151_v41 = vadd.f32 %v149_v33, %v145_v40 }
 0x240   :  { %v189_v42 = vmul.f32 -1.442695, %v151_v41 }
 0x242   :  { %219 = vpow2.f32 %v189_v42 }
 0x248   :  { %v218_v43 = vpop.eup %217 }
 0x249   :  { %v158_v44 = vadd.f32 1.0, %v218_v43 }
 0x24b   :  { %221 = vrcp.f32 %v158_v44 }
 0x24c   :  { %v220_v45 = vpop.eup %219 }
 0x24d   :  { %v159_v46 = vadd.f32 1.0, %v220_v45 }
 0x24f   :  { %223 = vrcp.f32 %v159_v46 }
 0x255   :  { %v222_v47 = vpop.eup %221 }
 0x256   :  { %164 = vst [vmem:[#allocation7] sm:$0xff] %v222_v47 }
 0x259   :  { %v224_v48 = vpop.eup %223 }
 0x25a   :  { %165 = vst [vmem:[#allocation7 + $0x8] sm:$0xff] %v224_v48 }
 0x25b   :  { %280 = shalt.err (!%p277_p6)
}
 0x25c   :  { %s281_s15 = scalar_lea.hbm %s368_s3, 256 }
 0x25d   :  { %p282_p7 = scmp.ne.s32.totalorder %s368_s3, %s281_s15  ;;  %p285_p8 = scmp.lt.u32.totalorder %s281_s15, %s368_s3 }
 0x25f   :  { %p287_p9 = pnand %p285_p8, %p282_p7 }
 0x261   :  { %290 = shalt.err (!%p287_p9)
}
 0x262   :  { %s304_s20 = smov 128   ;;  %s305_s21 = smov 8  }
 0x263   :  { %177 = dma.vmem_to_hbm [thread:$0]  %s172_s11, 256, %s368_s3, [#allocation4], %s304_s20, %s304_s20, %s305_s21  }
 0x264   :  { %295 = dma.done.wait [#allocation4], 256  }
 0x265   :  { %296 = vsyncadd [#allocation4], 4294967040 }
 0x266   :  { %181 = vsyncpa [#allocation3], 1 }
 0x267   :  { %182 = vsyncpa [#allocation6], 1 }
 0x268   :  { %183 = vsyncpa [#allocation4], 1 }

</bundles_post_ra>
